<compile_context>
chip_gen: v7x
topology: tpu7x:2x2x1
jax: 0.10.0
libtpu: 0.0.40
codegen_flags: <defaults>
</compile_context>

<pallas_src>
import functools

import jax
import jax.numpy as jnp
from jax.experimental import pallas as pl
from jax.experimental.pallas import tpu as pltpu


def _conv_bank_kernel(xpad_ref, w_ref, scale_ref, bias_ref, out_ref):
    # xpad_ref: (1, T + K - 1, E)   padded activations for one batch element
    # w_ref:    (K, E, c*K)         folded per-shift weights (resident)
    # scale_ref, bias_ref: (1, c*K) folded eval-mode BatchNorm
    # out_ref:  (1, T, c*K)
    k_shifts = w_ref.shape[0]
    t = out_ref.shape[1]
    acc = jnp.zeros(out_ref.shape[1:], jnp.float32)
    for d in range(k_shifts):                       # static unroll: K MXU matmuls
        x_d = xpad_ref[0, d:d + t, :]               # shifted row window (bf16)
        acc = acc + jnp.dot(x_d, w_ref[d], preferred_element_type=jnp.float32)
    y = acc * scale_ref[...] + bias_ref[...]        # folded BN (eval mode)
    y = jnp.maximum(y, 0.0)                         # ReLU
    out_ref[0] = y.astype(out_ref.dtype)


def fold_conv_bank_params(weights, bn_gamma, bn_beta, bn_mean, bn_var,
                          *, eps=1e-5, compute_dtype=jnp.bfloat16):
    """Fold per-kernel-size conv weights (PyTorch [c, emb_dim, k] layout) into
    K shift matrices [K, emb_dim, c*K] and eval-mode BN into scale/bias [1, c*K]."""
    num_k = len(weights)
    c, emb_dim, _ = weights[0].shape
    ck = c * num_k
    w_fold = jnp.zeros((num_k, emb_dim, ck), compute_dtype)
    for k in range(1, num_k + 1):
        w_k = weights[k - 1].astype(compute_dtype)          # [c, emb_dim, k]
        for j in range(k):
            d = j + num_k // 2 - k // 2                     # shift into max-padded x
            w_fold = w_fold.at[d, :, (k - 1) * c:k * c].set(w_k[:, :, j].T)
    inv_std = 1.0 / jnp.sqrt(bn_var.astype(jnp.float32) + eps)      # [K, c]
    scale = (bn_gamma.astype(jnp.float32) * inv_std).reshape(1, ck)
    bias = (bn_beta.astype(jnp.float32)
            - bn_mean.astype(jnp.float32) * bn_gamma.astype(jnp.float32) * inv_std
            ).reshape(1, ck)
    return w_fold, scale, bias


@functools.partial(jax.jit, static_argnames=("compute_dtype",))
def conv1d_bank_forward(x, w_fold, bn_scale, bn_bias, *, compute_dtype=jnp.bfloat16):
    """x: [B, emb_dim, T] -> [B, c*K, T]  (eval-mode Conv1dBank forward)."""
    batch, emb_dim, t = x.shape
    num_k, _, ck = w_fold.shape
    lpad, rpad = num_k // 2, (num_k - 1) // 2
    t_pad = t + num_k - 1

    # Layout plumbing: time-major rows + single shared halo, bf16 compute dtype.
    x_tm = jnp.transpose(x, (0, 2, 1))                       # [B, T, E]
    x_tm = jnp.pad(x_tm, ((0, 0), (lpad, rpad), (0, 0))).astype(compute_dtype)

    cdt_bytes = jnp.dtype(compute_dtype).itemsize
    flops = 2 * batch * t * emb_dim * ck * num_k
    bytes_accessed = (batch * t_pad * emb_dim * cdt_bytes       # activations in
                      + num_k * emb_dim * ck * cdt_bytes        # weights
                      + 2 * ck * 4                              # BN scale/bias
                      + batch * t * ck * jnp.dtype(x.dtype).itemsize)  # out

    out = pl.pallas_call(
        _conv_bank_kernel,
        out_shape=jax.ShapeDtypeStruct((batch, t, ck), x.dtype),
        grid_spec=pltpu.PrefetchScalarGridSpec(
            num_scalar_prefetch=0,
            grid=(batch,),
            in_specs=[
                pl.BlockSpec((1, t_pad, emb_dim), lambda b: (b, 0, 0)),  # padded x slab
                pl.BlockSpec((num_k, emb_dim, ck), lambda b: (0, 0, 0)),  # weights (resident)
                pl.BlockSpec((1, ck), lambda b: (0, 0)),                  # BN scale
                pl.BlockSpec((1, ck), lambda b: (0, 0)),                  # BN bias
            ],
            out_specs=pl.BlockSpec((1, t, ck), lambda b: (b, 0, 0)),
        ),
        compiler_params=pltpu.CompilerParams(
            dimension_semantics=("parallel",)),
        cost_estimate=pl.CostEstimate(
            flops=flops, transcendentals=0, bytes_accessed=bytes_accessed),
    )(x_tm, w_fold, bn_scale, bn_bias)

    return jnp.transpose(out, (0, 2, 1))                     # [B, c*K, T]


def init_conv1d_bank_params(key, num_k, c, emb_dim, dtype=jnp.float32):
    """kaiming_normal_ on conv weights (fan_in = emb_dim * k, gain=sqrt(2)),
    matching Conv1dBank._init_layer; conv has no bias."""
    keys = jax.random.split(key, num_k)
    weights = []
    for k in range(1, num_k + 1):
        std = (2.0 / (emb_dim * k)) ** 0.5
        w = (jax.random.normal(keys[k - 1], (c, emb_dim, k)) * std).astype(dtype)
        weights.append(w)
    return weights


def conv1d_bank_reference(x, weights, bn_gamma, bn_beta, bn_mean, bn_var,
                          *, eps=1e-5, compute_dtype=jnp.bfloat16):
    """Pure-JAX eval-mode reference for the PyTorch Conv1dBank forward."""
    num_k = len(weights)
    outs = []
    for k in range(1, num_k + 1):
        lp, rp = k // 2, (k - 1) // 2                        # get_pad(k)
        xp = jnp.pad(x, ((0, 0), (0, 0), (lp, rp))).astype(compute_dtype)
        y = jax.lax.conv_general_dilated(
            xp, weights[k - 1].astype(compute_dtype),
            window_strides=(1,), padding="VALID",
            dimension_numbers=("NCH", "OIH", "NCH"),
            preferred_element_type=jnp.float32)              # [B, c, T]
        scale = bn_gamma[k - 1] / jnp.sqrt(bn_var[k - 1] + eps)
        bias = bn_beta[k - 1] - bn_mean[k - 1] * scale
        y = y * scale[None, :, None] + bias[None, :, None]
        outs.append(jnp.maximum(y, 0.0))
    return jnp.concatenate(outs, axis=1).astype(x.dtype)


if __name__ == "__main__":
    key = jax.random.PRNGKey(0)
    k_w, k_x, k_g, k_b, k_m, k_v = jax.random.split(key, 6)

    K, c, emb_dim = 8, 16, 128        # c*K = 128 -> lane-dense output
    batch, seq = 2, 32

    weights = init_conv1d_bank_params(k_w, K, c, emb_dim)
    # Eval-mode BatchNorm params / running statistics (per kernel size, per channel).
    bn_gamma = 1.0 + 0.1 * jax.random.normal(k_g, (K, c), jnp.float32)
    bn_beta = 0.1 * jax.random.normal(k_b, (K, c), jnp.float32)
    bn_mean = 0.1 * jax.random.normal(k_m, (K, c), jnp.float32)
    bn_var = jnp.abs(1.0 + 0.1 * jax.random.normal(k_v, (K, c), jnp.float32))

    x = jax.random.normal(k_x, (batch, emb_dim, seq), jnp.float32)

    w_fold, bn_scale, bn_bias = fold_conv_bank_params(
        weights, bn_gamma, bn_beta, bn_mean, bn_var)

    y = conv1d_bank_forward(x, w_fold, bn_scale, bn_bias)
    y = jax.block_until_ready(y)

    ref = conv1d_bank_reference(x, weights, bn_gamma, bn_beta, bn_mean, bn_var)

    assert y.shape == (batch, c * K, seq), y.shape
    assert jnp.allclose(y, ref, atol=1e-2, rtol=1e-2), float(jnp.max(jnp.abs(y - ref)))

    print("KERNEL_OK")
</pallas_src>

<mosaic_0001>
module attributes {stable_mosaic.version = 11 : i64} {
  func.func @_conv_bank_kernel(%arg0: i32, %arg1: memref<1x39x128xbf16, #tpu.memory_space<vmem>>, %arg2: memref<8x128x128xbf16, #tpu.memory_space<vmem>>, %arg3: memref<1x128xf32, #tpu.memory_space<vmem>>, %arg4: memref<1x128xf32, #tpu.memory_space<vmem>>, %arg5: memref<1x32x128xf32, #tpu.memory_space<vmem>>) attributes {dimension_semantics = [#tpu.dimension_semantics<parallel>], iteration_bounds = array<i64: 2>, scalar_prefetch = 0 : i64, scratch_operands = 0 : i64, tpu.core_type = #tpu.core_type<tc>, window_params = [{transform_indices = @transform_0, window_bounds = array<i64: 1, 39, 128>}, {pipeline_mode = #tpu.pipeline_mode<synchronous>, transform_indices = @transform_1, window_bounds = array<i64: 8, 128, 128>}, {pipeline_mode = #tpu.pipeline_mode<synchronous>, transform_indices = @transform_2, window_bounds = array<i64: 1, 128>}, {pipeline_mode = #tpu.pipeline_mode<synchronous>, transform_indices = @transform_3, window_bounds = array<i64: 1, 128>}, {transform_indices = @transform_4, window_bounds = array<i64: 1, 32, 128>}]} {
    %cst = arith.constant 0.000000e+00 : f32
    %0 = vector.broadcast %cst : f32 to vector<32x128xf32>
    %c0 = arith.constant 0 : index
    %c0_0 = arith.constant 0 : index
    %c0_1 = arith.constant 0 : index
    %1 = vector.load %arg1[%c0, %c0_0, %c0_1] : memref<1x39x128xbf16, #tpu.memory_space<vmem>>, vector<1x32x128xbf16>
    %2 = vector.shape_cast %1 : vector<1x32x128xbf16> to vector<32x128xbf16>
    %c0_2 = arith.constant 0 : index
    %c0_3 = arith.constant 0 : index
    %c0_4 = arith.constant 0 : index
    %3 = vector.load %arg2[%c0_2, %c0_3, %c0_4] : memref<8x128x128xbf16, #tpu.memory_space<vmem>>, vector<1x128x128xbf16>
    %4 = vector.shape_cast %3 : vector<1x128x128xbf16> to vector<128x128xbf16>
    %cst_5 = arith.constant dense<0.000000e+00> : vector<32x128xf32>
    %5 = tpu.matmul %2, %4, %cst_5 {dimension_numbers = #tpu.dot_dimension_numbers<[1], [0], [0], [1], [0, 0, 1, 1], [], []>} : vector<32x128xbf16>, vector<128x128xbf16>, vector<32x128xf32> -> vector<32x128xf32>
    %6 = arith.addf %0, %5 : vector<32x128xf32>
    %c0_6 = arith.constant 0 : index
    %c1 = arith.constant 1 : index
    %c0_7 = arith.constant 0 : index
    %7 = vector.load %arg1[%c0_6, %c1, %c0_7] : memref<1x39x128xbf16, #tpu.memory_space<vmem>>, vector<1x32x128xbf16>
    %8 = vector.shape_cast %7 : vector<1x32x128xbf16> to vector<32x128xbf16>
    %c1_8 = arith.constant 1 : index
    %c0_9 = arith.constant 0 : index
    %c0_10 = arith.constant 0 : index
    %9 = vector.load %arg2[%c1_8, %c0_9, %c0_10] : memref<8x128x128xbf16, #tpu.memory_space<vmem>>, vector<1x128x128xbf16>
    %10 = vector.shape_cast %9 : vector<1x128x128xbf16> to vector<128x128xbf16>
    %cst_11 = arith.constant dense<0.000000e+00> : vector<32x128xf32>
    %11 = tpu.matmul %8, %10, %cst_11 {dimension_numbers = #tpu.dot_dimension_numbers<[1], [0], [0], [1], [0, 0, 1, 1], [], []>} : vector<32x128xbf16>, vector<128x128xbf16>, vector<32x128xf32> -> vector<32x128xf32>
    %12 = arith.addf %6, %11 : vector<32x128xf32>
    %c0_12 = arith.constant 0 : index
    %c2 = arith.constant 2 : index
    %c0_13 = arith.constant 0 : index
    %13 = vector.load %arg1[%c0_12, %c2, %c0_13] : memref<1x39x128xbf16, #tpu.memory_space<vmem>>, vector<1x32x128xbf16>
    %14 = vector.shape_cast %13 : vector<1x32x128xbf16> to vector<32x128xbf16>
    %c2_14 = arith.constant 2 : index
    %c0_15 = arith.constant 0 : index
    %c0_16 = arith.constant 0 : index
    %15 = vector.load %arg2[%c2_14, %c0_15, %c0_16] : memref<8x128x128xbf16, #tpu.memory_space<vmem>>, vector<1x128x128xbf16>
    %16 = vector.shape_cast %15 : vector<1x128x128xbf16> to vector<128x128xbf16>
    %cst_17 = arith.constant dense<0.000000e+00> : vector<32x128xf32>
    %17 = tpu.matmul %14, %16, %cst_17 {dimension_numbers = #tpu.dot_dimension_numbers<[1], [0], [0], [1], [0, 0, 1, 1], [], []>} : vector<32x128xbf16>, vector<128x128xbf16>, vector<32x128xf32> -> vector<32x128xf32>
    %18 = arith.addf %12, %17 : vector<32x128xf32>
    %c0_18 = arith.constant 0 : index
    %c3 = arith.constant 3 : index
    %c0_19 = arith.constant 0 : index
    %19 = vector.load %arg1[%c0_18, %c3, %c0_19] : memref<1x39x128xbf16, #tpu.memory_space<vmem>>, vector<1x32x128xbf16>
    %20 = vector.shape_cast %19 : vector<1x32x128xbf16> to vector<32x128xbf16>
    %c3_20 = arith.constant 3 : index
    %c0_21 = arith.constant 0 : index
    %c0_22 = arith.constant 0 : index
    %21 = vector.load %arg2[%c3_20, %c0_21, %c0_22] : memref<8x128x128xbf16, #tpu.memory_space<vmem>>, vector<1x128x128xbf16>
    %22 = vector.shape_cast %21 : vector<1x128x128xbf16> to vector<128x128xbf16>
    %cst_23 = arith.constant dense<0.000000e+00> : vector<32x128xf32>
    %23 = tpu.matmul %20, %22, %cst_23 {dimension_numbers = #tpu.dot_dimension_numbers<[1], [0], [0], [1], [0, 0, 1, 1], [], []>} : vector<32x128xbf16>, vector<128x128xbf16>, vector<32x128xf32> -> vector<32x128xf32>
    %24 = arith.addf %18, %23 : vector<32x128xf32>
    %c0_24 = arith.constant 0 : index
    %c4 = arith.constant 4 : index
    %c0_25 = arith.constant 0 : index
    %25 = vector.load %arg1[%c0_24, %c4, %c0_25] : memref<1x39x128xbf16, #tpu.memory_space<vmem>>, vector<1x32x128xbf16>
    %26 = vector.shape_cast %25 : vector<1x32x128xbf16> to vector<32x128xbf16>
    %c4_26 = arith.constant 4 : index
    %c0_27 = arith.constant 0 : index
    %c0_28 = arith.constant 0 : index
    %27 = vector.load %arg2[%c4_26, %c0_27, %c0_28] : memref<8x128x128xbf16, #tpu.memory_space<vmem>>, vector<1x128x128xbf16>
    %28 = vector.shape_cast %27 : vector<1x128x128xbf16> to vector<128x128xbf16>
    %cst_29 = arith.constant dense<0.000000e+00> : vector<32x128xf32>
    %29 = tpu.matmul %26, %28, %cst_29 {dimension_numbers = #tpu.dot_dimension_numbers<[1], [0], [0], [1], [0, 0, 1, 1], [], []>} : vector<32x128xbf16>, vector<128x128xbf16>, vector<32x128xf32> -> vector<32x128xf32>
    %30 = arith.addf %24, %29 : vector<32x128xf32>
    %c0_30 = arith.constant 0 : index
    %c5 = arith.constant 5 : index
    %c0_31 = arith.constant 0 : index
    %31 = vector.load %arg1[%c0_30, %c5, %c0_31] : memref<1x39x128xbf16, #tpu.memory_space<vmem>>, vector<1x32x128xbf16>
    %32 = vector.shape_cast %31 : vector<1x32x128xbf16> to vector<32x128xbf16>
    %c5_32 = arith.constant 5 : index
    %c0_33 = arith.constant 0 : index
    %c0_34 = arith.constant 0 : index
    %33 = vector.load %arg2[%c5_32, %c0_33, %c0_34] : memref<8x128x128xbf16, #tpu.memory_space<vmem>>, vector<1x128x128xbf16>
    %34 = vector.shape_cast %33 : vector<1x128x128xbf16> to vector<128x128xbf16>
    %cst_35 = arith.constant dense<0.000000e+00> : vector<32x128xf32>
    %35 = tpu.matmul %32, %34, %cst_35 {dimension_numbers = #tpu.dot_dimension_numbers<[1], [0], [0], [1], [0, 0, 1, 1], [], []>} : vector<32x128xbf16>, vector<128x128xbf16>, vector<32x128xf32> -> vector<32x128xf32>
    %36 = arith.addf %30, %35 : vector<32x128xf32>
    %c0_36 = arith.constant 0 : index
    %c6 = arith.constant 6 : index
    %c0_37 = arith.constant 0 : index
    %37 = vector.load %arg1[%c0_36, %c6, %c0_37] : memref<1x39x128xbf16, #tpu.memory_space<vmem>>, vector<1x32x128xbf16>
    %38 = vector.shape_cast %37 : vector<1x32x128xbf16> to vector<32x128xbf16>
    %c6_38 = arith.constant 6 : index
    %c0_39 = arith.constant 0 : index
    %c0_40 = arith.constant 0 : index
    %39 = vector.load %arg2[%c6_38, %c0_39, %c0_40] : memref<8x128x128xbf16, #tpu.memory_space<vmem>>, vector<1x128x128xbf16>
    %40 = vector.shape_cast %39 : vector<1x128x128xbf16> to vector<128x128xbf16>
    %cst_41 = arith.constant dense<0.000000e+00> : vector<32x128xf32>
    %41 = tpu.matmul %38, %40, %cst_41 {dimension_numbers = #tpu.dot_dimension_numbers<[1], [0], [0], [1], [0, 0, 1, 1], [], []>} : vector<32x128xbf16>, vector<128x128xbf16>, vector<32x128xf32> -> vector<32x128xf32>
    %42 = arith.addf %36, %41 : vector<32x128xf32>
    %c0_42 = arith.constant 0 : index
    %c7 = arith.constant 7 : index
    %c0_43 = arith.constant 0 : index
    %43 = vector.load %arg1[%c0_42, %c7, %c0_43] : memref<1x39x128xbf16, #tpu.memory_space<vmem>>, vector<1x32x128xbf16>
    %44 = vector.shape_cast %43 : vector<1x32x128xbf16> to vector<32x128xbf16>
    %c7_44 = arith.constant 7 : index
    %c0_45 = arith.constant 0 : index
    %c0_46 = arith.constant 0 : index
    %45 = vector.load %arg2[%c7_44, %c0_45, %c0_46] : memref<8x128x128xbf16, #tpu.memory_space<vmem>>, vector<1x128x128xbf16>
    %46 = vector.shape_cast %45 : vector<1x128x128xbf16> to vector<128x128xbf16>
    %cst_47 = arith.constant dense<0.000000e+00> : vector<32x128xf32>
    %47 = tpu.matmul %44, %46, %cst_47 {dimension_numbers = #tpu.dot_dimension_numbers<[1], [0], [0], [1], [0, 0, 1, 1], [], []>} : vector<32x128xbf16>, vector<128x128xbf16>, vector<32x128xf32> -> vector<32x128xf32>
    %48 = arith.addf %42, %47 : vector<32x128xf32>
    %c0_48 = arith.constant 0 : index
    %c0_49 = arith.constant 0 : index
    %49 = vector.load %arg3[%c0_48, %c0_49] : memref<1x128xf32, #tpu.memory_space<vmem>>, vector<1x128xf32>
    %50 = vector.broadcast %49 : vector<1x128xf32> to vector<32x128xf32>
    %51 = arith.mulf %48, %50 : vector<32x128xf32>
    %c0_50 = arith.constant 0 : index
    %c0_51 = arith.constant 0 : index
    %52 = vector.load %arg4[%c0_50, %c0_51] : memref<1x128xf32, #tpu.memory_space<vmem>>, vector<1x128xf32>
    %53 = vector.broadcast %52 : vector<1x128xf32> to vector<32x128xf32>
    %54 = arith.addf %51, %53 : vector<32x128xf32>
    %cst_52 = arith.constant 0.000000e+00 : f32
    %55 = vector.broadcast %cst_52 : f32 to vector<32x128xf32>
    %56 = arith.maximumf %54, %55 : vector<32x128xf32>
    %c0_53 = arith.constant 0 : index
    %c0_54 = arith.constant 0 : index
    %c0_55 = arith.constant 0 : index
    %57 = vector.load %arg5[%c0_53, %c0_54, %c0_55] : memref<1x32x128xf32, #tpu.memory_space<vmem>>, vector<1x32x128xf32>
    %58 = vector.shape_cast %57 : vector<1x32x128xf32> to vector<32x128xf32>
    %59 = vector.shape_cast %56 : vector<32x128xf32> to vector<1x32x128xf32>
    tpu.vector_store %arg5[%c0_53, %c0_54, %c0_55], %59 {strides = array<i32>} : memref<1x32x128xf32, #tpu.memory_space<vmem>>, vector<1x32x128xf32>,
    return
  }
  func.func @transform_0(%arg0: i32) -> (i32, i32, i32) {
    %c0_i32 = arith.constant 0 : i32
    %c0_i32_0 = arith.constant 0 : i32
    %c0_i32_1 = arith.constant 0 : i32
    return %arg0, %c0_i32, %c0_i32_0 : i32, i32, i32
  }
  func.func @transform_1(%arg0: i32) -> (i32, i32, i32) {
    %c0_i32 = arith.constant 0 : i32
    %c0_i32_0 = arith.constant 0 : i32
    %c0_i32_1 = arith.constant 0 : i32
    %c0_i32_2 = arith.constant 0 : i32
    return %c0_i32, %c0_i32_0, %c0_i32_1 : i32, i32, i32
  }
  func.func @transform_2(%arg0: i32) -> (i32, i32) {
    %c0_i32 = arith.constant 0 : i32
    %c0_i32_0 = arith.constant 0 : i32
    %c0_i32_1 = arith.constant 0 : i32
    return %c0_i32, %c0_i32_0 : i32, i32
  }
  func.func @transform_3(%arg0: i32) -> (i32, i32) {
    %c0_i32 = arith.constant 0 : i32
    %c0_i32_0 = arith.constant 0 : i32
    %c0_i32_1 = arith.constant 0 : i32
    return %c0_i32, %c0_i32_0 : i32, i32
  }
  func.func @transform_4(%arg0: i32) -> (i32, i32, i32) {
    %c0_i32 = arith.constant 0 : i32
    %c0_i32_0 = arith.constant 0 : i32
    %c0_i32_1 = arith.constant 0 : i32
    return %arg0, %c0_i32, %c0_i32_0 : i32, i32, i32
  }
}

</mosaic_0001>

<bundles_post_ra>
// kernel: conv1d_bank_forward.1
= control target key start
LH: loop header
LB: loop body
LE: loop exit
PB: predicated region body
PF: predicated region fallthrough
CT: control target
= control target key end

     0   :  { %9 = vsyncpa [#allocation3], 0  ;;  %s2295_s0 = inlined_call_operand.vmem [shape: bf16[2,39,128], index: 0, kind: input, shape index: {}]   ;;  %s2296_s1 = inlined_call_operand.hbm [shape: bf16[8,128,128], index: 1, kind: input, shape index: {}]   ;;  %s2297_s2 = inlined_call_operand.vmem [shape: f32[1,128], index: 2, kind: input, shape index: {}]   ;;  %s2298_s3 = inlined_call_operand.vmem [shape: f32[1,128], index: 3, kind: input, shape index: {}]   ;;  %s2299_s4 = inlined_call_operand.hbm [shape: f32[2,32,128], index: 4, kind: output, shape index: {}]  }
   0x1   :  { %10 = vsyncpa [#allocation4], 0 }
   0x2   :  { %12 = vsyncpa [#allocation4 + $0x1], 0  ;;  %s2040_s15 = smov 0   ;;  %s2042_s16 = smov 0  }
   0x3   :  { %s2044_s17 = smov 0   ;;  %s2046_s18 = smov 0  }
   0x4 LB: > { %s2061_s19 = sadd.s32 4294967295, %s2007_s18   ;;  %s1428_s20 = sadd.s32 4294967294, %s2007_s18   ;;  %s2007_s18 = sphi %s2046_s18, %s2315_s18   ;;  %s2003_s17 = sphi %s2044_s17, %s2314_s17   ;;  %s1999_s16 = sphi %s2042_s16, %s2313_s16   ;;  %s1995_s15 = sphi %s2040_s15, %s2312_s15  }
   0x5   : > { %s2065_s21 = sadd.s32 1, %s2007_s18   ;;  %s114_s22 = sadd.s32 1, %s2003_s17 }
   0x6   : > { %s111_s23 = ssub.s32 %s2007_s18, %s2065_s21  ;;  %p124_p0 = scmp.ne.s32.totalorder %s2003_s17, %s1999_s16 }
   0x7   : > { %p112_p1 = scmp.eq.s32.totalorder %s111_s23, 0  ;;  %p125_p2 = scmp.eq.s32.totalorder %s2061_s19, 1 }
   0x8   : > { %p130_p3 = scmp.ne.s32.totalorder %s1999_s16, %s1995_s15  ;;  %p131_p4 = scmp.eq.s32.totalorder %s1428_s20, 1 }
   0x9   : > { %s2076_s24 = scalar_select %p112_p1, %s2003_s17, %s114_s22  }
   0xa   : > { %p2078_p5 = por %p125_p2, %p124_p0  ;;  %p2082_p6 = por %p131_p4, %p130_p3 }
   0xb   : > { %p1429_p7 = scmp.ge.s32.totalorder %s2007_s18, 1  ;;  %p138_p8 = scmp.lt.s32.totalorder %s2007_s18, 3 }
   0xc   : > { %s2303_s25 = scalar_select %p2078_p5, 1, 0 }
   0xd   : > { %s2304_s26 = scalar_select %p2082_p6, 1, 0 }
   0xe   : > { %p2300_p9 = scmp.eq.s32.totalorder %s2061_s19, 0  ;;  %p2089_p10 = pnand %p1429_p7, %p138_p8 }
   0xf   : > { %s2009_s28 = smov [#allocation2]   ;;  %s1913_s7 = scalar_lea.hbm %s2296_s1, 8192 }
  0x10   : > { %s2305_s27 = scalar_select %p2089_p10, 1, 0 }
  0x11   : > { %s150_s29 = sshll.u32 %s2009_s28, 4  ;;  %p1792_p11 = pneg %p2089_p10  ;;  %s151_s29 = int_to_ptr.vmem [resolvable:$true] %s150_s29 }
  0x12   : > { %p1914_p13 = scmp.ne.s32.totalorder %s2296_s1, %s1913_s7  ;;  %p1920_p3 = scmp.lt.u32.totalorder %s1913_s7, %s2296_s1 }
  0x13   : > { %p2097_p12 = pnand %p2300_p9, %p1792_p11 }
  0x15   : > { %p1915_p0 = pneg %p2097_p12 }
  0x17   : > { %p1916_p1 = pnand %p1915_p0, %p1914_p13 }
  0x19   : > { %p1917_p2 = pneg %p1916_p1 }
  0x1b   : > { %p1922_p4 = pnand %p1920_p3, %p1917_p2 }
  0x1d   : > { %1925 = shalt.err (!%p1922_p4)
}
  0x1e   : > { %s1926_s12 = scalar_lea.vmem %s151_s29, 8192  ;;  %p1934_p9 = scmp.lt.s32.totalorder %s151_s29, %s151_s29 }
  0x1f   : > { %p1927_p7 = scmp.ne.s32.totalorder %s151_s29, %s1926_s12  ;;  %p1935_p6 = scmp.lt.s32.totalorder %s1926_s12, %s1926_s12 }
  0x21   : > { %p1929_p8 = pnand %p1927_p7, %p1915_p0  ;;  %p1936_p5 = por %p1935_p6, %p1934_p9 }
  0x23   : > { %p1930_p11 = pneg %p1929_p8 }
  0x25   : > { %p1937_p10 = pnand %p1936_p5, %p1930_p11 }
  0x27   : > { %1940 = shalt.err (!%p1937_p10)
}
  0x28   : > { %s2010_s13 = smov 64   ;;  %s2011_s14 = smov 4  }
  0x29   : > { %1795 = dma.hbm_to_vmem [thread:$0]  (!%p2097_p12), %s2296_s1, 8192, %s151_s29, [#allocation3], %s2010_s13, %s2010_s13, %s2011_s14  }
  0x2a   : > { %p2307_p13 = scmp.ne.s32.totalorder %s2305_s27, 0 }
  0x2b   : > { %p2308_p1 = scmp.eq.s32.totalorder (!%p2307_p13), %s2061_s19, 0 }
  0x2c   : > { %180 = sbr.rel (%p2307_p13) target bundleno = 420 (0x1a4), region = 36 }
  0x33   : > { %1986 = dma.done.wait (%p2308_p1), [#allocation3], 8192   ;;  %p2309_p0 = pmov %p2308_p1 }
  0x34   : > { %v1840_v0 = vld [vmem:[#allocation2 + $0x40] sm:$0xff]   ;;  %p206_p5 = scmp.lt.s32.totalorder %s2061_s19, 1  ;;  %v1842_v2 = vld [vmem:[#allocation2 + $0x48] sm:$0xff]   ;;  %v1844_v4 = vld [vmem:[#allocation2 + $0x50] sm:$0xff]   ;;  %vm263_vm0 = vsmask.f32 7424 }
  0x35   : > { %1988 = vsyncadd (%p2309_p0), [#allocation3], 4294959104  ;;  %v1841_v1 = vld [vmem:[#allocation2 + $0x100] sm:$0xff]   ;;  %1597 = vmatprep.subr.bf16.mxu1 %v1840_v0  ;;  %v1843_v3 = vld [vmem:[#allocation2 + $0x108] sm:$0xff]   ;;  %vm779_vm1 = vcmask 1045504   ;;  %vm503_vm3 = vcmask 1046528  }
  0x36   : > { %1677 = vmatprep.subr.bf16.mxu0 %v1841_v1  ;;  %1598 = vmatpush3.bf16.msra.mxu1 %v1840_v0  ;;  %v1845_v5 = vld [vmem:[#allocation2 + $0x110] sm:$0xff]   ;;  %s207_s23 = scalar_select %p206_p5, %s2061_s19, 1  ;;  %v1846_v6 = vld [vmem:[#allocation2 + $0x58] sm:$0xff]   ;;  %v1848_v8 = vld [vmem:[#allocation2 + $0x60] sm:$0xff]   ;;  %vm909_vm2 = vsmask.f32 5376 }
  0x37   : > { %1678 = vmatpush3.bf16.msra.mxu0 %v1841_v1  ;;  %1599 = vmatprep.subr.bf16.mxu1 %v1842_v2  ;;  %v1847_v7 = vld [vmem:[#allocation2 + $0x118] sm:$0xff]   ;;  %v1849_v9 = vld [vmem:[#allocation2 + $0x120] sm:$0xff]   ;;  %v1850_v10 = vld [vmem:[#allocation2 + $0x68] sm:$0xff]   ;;  %vm1055_vm4 = vcmask 1044480   ;;  %vm633_vm5 = vsmask.f32 6400 }
  0x38   : > { %1679 = vmatprep.subr.bf16.mxu0 %v1843_v3  ;;  %s1785_s27 = smul.u32 20, %s207_s23  ;;  %v1851_v11 = vld [vmem:[#allocation2 + $0x128] sm:$0xff]   ;;  %v1852_v17 = vld [vmem:[#allocation2 + $0x70] sm:$0xff]   ;;  %v1854_v33 = vld [vmem:[#allocation2 + $0x78] sm:$0xff]   ;;  %vm1185_vm6 = vsmask.f32 4352 }
  0x39   : > { %v1853_v22 = vld [vmem:[#allocation2 + $0x130] sm:$0xff]   ;;  %v1855_v34 = vld [vmem:[#allocation2 + $0x138] sm:$0xff]   ;;  %v1858_v36 = vld [vmem:[#allocation2] sm:$0xff]   ;;  %s203_s5 = sand.u32 1, %s1999_s16   ;;  %s1516_s13 = sshll.u32 %s2061_s19, 9 }
  0x3a   : > { %1600 = vmatpush3.bf16.msra.mxu1 %v1842_v2  ;;  %s2128_s30 = scalar_lea.vmem %s2295_s0, %s1785_s27  ;;  %v1860_v42 = vld [vmem:[#allocation2 + $0x140] sm:$0xff]   ;;  %v1863_v48 = vld [vmem:[#allocation2 + $0x8] sm:$0xff]   ;;  %v1865_v53 = vld [vmem:[#allocation2 + $0x10] sm:$0xff]   ;;  %s1434_s8 = sshll.u32 %s203_s5, 5 }
  0x3b   : > { %1680 = vmatpush3.bf16.msra.mxu0 %v1843_v3  ;;  %1601 = vmatprep.subr.bf16.mxu1 %v1844_v4  ;;  %v212_v12 = vld [vmem:[%s2128_s30] sm:$0xf]  ;;  %v2132_v13 = vld [vmem:[%s2128_s30 + $0x4] sm:$0xf]  ;;  %v2138_v15 = vld [vmem:[%s2128_s30 + $0x8] sm:$0xff]   ;;  %s205_s11 = scalar_lea.vmem [#allocation5], %s1434_s8  ;;  %s2250_s22 = scalar_lea.hbm %s2299_s4, %s1516_s13 }
  0x3c   : > { %1681 = vmatprep.subr.bf16.mxu0 %v1845_v5  ;;  %v2135_v14 = vcombine.low %v212_v12, %v2132_v13  ;;  %v758_v16 = vld [vmem:[%s2128_s30] sm:$0xc]  ;;  %v2144_v20 = vshll.u32 %v2138_v15, 16  ;;  %v781_v23 = vrot.slane %v2138_v15, 2  ;;  %v2157_v31 = vshrl.u32 %v2138_v15, 16  ;;  %v1864_v51 = vld [vmem:[#allocation2 + $0x148] sm:$0xff]  }
  0x3d   : > { %v1473_v21 = vcombine.low %v758_v16, %v2132_v13  ;;  %v2150_v27 = vld [vmem:[%s2128_s30 + $0x10] ss:$0 sps:$4 sm:$0x11]   ;;  %v1866_v56 = vld [vmem:[#allocation2 + $0x150] sm:$0xff]   ;;  %v1867_v58 = vld [vmem:[#allocation2 + $0x18] sm:$0xff]   ;;  %s1354_s12 = sshll.u32 %s205_s11, 4  ;;  %s2245_s12 = int_to_ptr.vmem [resolvable:$true] %s1354_s12 }
  0x3e   : > { %1602 = vmatpush3.bf16.msra.mxu1 %v1844_v4  ;;  %v265_v18 = vshrl.u32 %v2135_v14, 16  ;;  %v267_v19 = vshll.u32 %v2135_v14, 16  ;;  %v274_v25 = vrot.slane %v2144_v20, 1  ;;  %v2153_v28 = vld [vmem:[%s2128_s30 + $0x10] ss:$0 sps:$4 sm:$0x33]  }
  0x3f   : > { %1682 = vmatpush3.bf16.msra.mxu0 %v1845_v5  ;;  %1603 = vmatprep.subr.bf16.mxu1 %v1846_v6  ;;  %v780_v26 = vrot.slane %v1473_v21, 2  ;;  %v280_v32 = vshll.u32 %v2150_v27, 16  ;;  %v911_v39 = vshrl.u32 %v1473_v21, 16  ;;  %v783_v40 = vrot.slane %v2153_v28, 2  ;;  %v1868_v60 = vld [vmem:[#allocation2 + $0x158] sm:$0xff]   ;;  %v1869_v61 = vld [vmem:[#allocation2 + $0x20] sm:$0xff]  }
  0x40   : > { %1683 = vmatprep.subr.bf16.mxu0 %v1847_v7  ;;  %v269_v24 = vrot.slane %v267_v19, 1  ;;  %v278_v37 = vor.u32 %v2157_v31, %v274_v25  ;;  %v914_v41 = vshll.u32 %v1473_v21, 16  ;;  %v918_v46 = vrot.slane %v2157_v31, 2  ;;  %v2178_v63 = vld [vmem:[%s2128_s30 + $0x10] ss:$0 sps:$4 sm:$0x77]  }
  0x41   : > { %v782_v30 = vsel %vm779_vm1, %v780_v26, %v781_v23  ;;  %v282_v38 = vrot.slane %v280_v32, 1  ;;  %v913_v43 = vrot.slane %v911_v39, 2  ;;  %v784_v47 = vsel %vm779_vm1, %v781_v23, %v783_v40  ;;  %v1870_v0 = vld [vmem:[#allocation2 + $0x160] sm:$0xff]   ;;  %v1871_v2 = vld [vmem:[#allocation2 + $0x28] sm:$0xff]   ;;  %v482_v12 = vld [vmem:[%s2128_s30] sm:$0xe] }
  0x42   : > { %1604 = vmatpush3.bf16.msra.mxu1 %v1846_v6  ;;  %v270_v29 = vor.u32 %v269_v24, %v265_v18  ;;  %1693 = vmatprep.mubr.bf16.mxu0 %v782_v30  ;;  %v916_v44 = vrot.slane %v914_v41, 3  ;;  %v919_v50 = vrot.slane %v2144_v20, 3  ;;  %v642_v55 = vrot.slane %v2157_v31, 1  ;;  %v1872_v4 = vld [vmem:[#allocation2 + $0x168] sm:$0xff]   ;;  %v1876_v16 = vld [vmem:[#allocation2 + $0x178] sm:$0xff]   ;;  %v1877_v21 = vld [vmem:[#allocation2 + $0x80] sm:$0xff]  }
  0x43   : > { %1684 = vmatpush3.bf16.msra.mxu0 %v1847_v7  ;;  %1605 = vmatprep.subr.bf16.mxu1 %v1848_v8  ;;  %v283_v45 = vsel %vm263_vm0, %v278_v37, %v282_v38  ;;  %v643_v57 = vrot.slane %v2144_v20, 2  ;;  %v1194_v62 = vrot.slane %v2157_v31, 3  ;;  %v1195_v1 = vrot.slane %v2144_v20, 4  ;;  %v1873_v7 = vld [vmem:[#allocation2 + $0x30] sm:$0xff]   ;;  %v1878_v24 = vld [vmem:[#allocation2 + $0x180] sm:$0xff]   ;;  %v1880_v31 = vld [vmem:[#allocation2 + $0x88] sm:$0xff]  }
  0x44   : > { %1685 = vmatprep.subr.bf16.mxu0 %v1849_v9  ;;  %v275_v35 = vsel %vm263_vm0, %v270_v29, %v274_v25  ;;  %v917_v49 = vor.u32 %v916_v44, %v913_v43  ;;  %v2167_v52 = vor.u32 %v919_v50, %v918_v46  ;;  %v923_v5 = vshrl.u32 %v2178_v63, 16  ;;  %v1881_v32 = vld [vmem:[#allocation2 + $0x188] sm:$0xff]   ;;  %v1883_v37 = vld [vmem:[#allocation2 + $0x190] sm:$0xff]   ;;  %v1884_v40 = vld [vmem:[#allocation2 + $0x98] sm:$0xff]   ;;  %s2254_s19 = scalar_lea.sflag [#allocation4], %s203_s5  ;;  %s1941_s23 = scalar_lea.vmem %s2245_s12, 512 }
  0x45   : > { %1613 = vmatprep.mubr.bf16.mxu1 %v275_v35  ;;  %v2174_v59 = vor.u32 %v643_v57, %v642_v55  ;;  %v2181_v3 = vor.u32 %v1195_v1, %v1194_v62  ;;  %v926_v6 = vshll.u32 %v2178_v63, 16  ;;  %v647_v18 = vshrl.u32 %v2153_v28, 16  ;;  %v1912_v39 = vld [vmem:[%s2128_s30 + $0x10] ss:$0 sps:$4 sm:$0xff]   ;;  %v1885_v41 = vld [vmem:[#allocation2 + $0x198] sm:$0xff]   ;;  %v1886_v46 = vld [vmem:[#allocation2 + $0xa0] sm:$0xff]   ;;  %p1942_p6 = scmp.ne.s32.totalorder %s2245_s12, %s1941_s23 }
  0x46   : > { %1606 = vmatpush3.bf16.msra.mxu1 %v1848_v8  ;;  %v921_v54 = vsel %vm909_vm2, %v917_v49, %v2167_v52  ;;  %v1874_v8 = vld [vmem:[#allocation2 + $0x170] sm:$0xff]   ;;  %v650_v20 = vshll.u32 %v2153_v28, 16  ;;  %v505_v23 = vrot.slane %v2138_v15, 1  ;;  %v1057_v25 = vrot.slane %v2138_v15, 3  ;;  %v1888_v50 = vld [vmem:[#allocation2 + $0xa8] sm:$0xff]   ;;  %p2310_p9 = scmp.ne.s32.totalorder %s2303_s25, 0 }
  0x47   : > { %1686 = vmatpush3.bf16.msra.mxu0 %v1849_v9  ;;  %1607 = vmatprep.subr.bf16.mxu1 %v1850_v10  ;;  %v1875_v9 = vld [vmem:[#allocation2 + $0x38] sm:$0xff]   ;;  %v649_v29 = vrot.slane %v647_v18, 1  ;;  %v1202_v43 = vshll.u32 %v1912_v39, 16  ;;  %v1905_v18 = vld [vmem:[#allocation2 + $0x1e0] sm:$0xff]   ;;  %s2012_s27 = smov [#allocation5]  }
  0x48   : > { %1687 = vmatprep.subr.bf16.mxu0 %v1851_v11  ;;  %p1943_p10 = pnand %p1942_p6, %p2310_p9  ;;  %s1945_s28 = sshll.u32 %s2012_s27, 4  ;;  %s1946_s28 = int_to_ptr.vmem [resolvable:$false] %s1945_s28 }
  0x49   : > { %s1947_s29 = scalar_lea.vmem %s1946_s28, 1024  ;;  %p1948_p2 = scmp.lt.s32.totalorder %s2245_s12, %s1946_s28 }
  0x4a   : > { %1608 = vmatpush3.bf16.msra.mxu1 %v1850_v10  ;;  %v925_v10 = vrot.slane %v923_v5, 2  ;;  %v1059_v5 = vrot.slane %v2178_v63, 3  ;;  %p1944_p12 = pneg %p1943_p10  ;;  %p1949_p3 = scmp.lt.s32.totalorder %s1947_s29, %s1941_s23 }
  0x4b   : > { %1688 = vmatpush3.bf16.msra.mxu0 %v1851_v11  ;;  %1609 = vmatprep.subr.bf16.mxu1 %v1852_v17  ;;  %v928_v11 = vrot.slane %v926_v6, 3  ;;  %v1897_v6 = vld [vmem:[#allocation2 + $0x1c0] sm:$0xff]  }
  0x4c   : > { %1689 = vmatprep.subr.bf16.mxu0 %v1853_v22  ;;  %p1950_p4 = por %p1949_p3, %p1948_p2 }
  0x4e   : > { %1610 = vmatpush3.bf16.msra.mxu1 %v1852_v17  ;;  %v2188_v17 = vcombine.low %v482_v12, %v2132_v13  ;;  %p1951_p7 = pnand %p1950_p4, %p1944_p12 }
  0x4f   : > { %1690 = vmatpush3.bf16.msra.mxu0 %v1853_v22  ;;  %1611 = vmatprep.subr.bf16.mxu1 %v1854_v33  ;;  %v929_v22 = vor.u32 %v928_v11, %v925_v10  ;;  %v1898_v10 = vld [vmem:[#allocation2 + $0xc8] sm:$0xff]  }
  0x50   : > { %1691 = vmatprep.subr.bf16.mxu0 %v1855_v34  ;;  %v504_v26 = vrot.slane %v2188_v17, 1  ;;  %v638_v55 = vshll.u32 %v2188_v17, 16  ;;  %v1899_v11 = vld [vmem:[#allocation2 + $0x1c8] sm:$0xff]  }
  0x51   : > { %v930_v28 = vsel %vm909_vm2, %v2167_v52, %v929_v22  ;;  %v1890_v52 = vld [vmem:[#allocation2 + $0xb0] sm:$0xff]   ;;  %v1910_v22 = vld [vmem:[#allocation2 + $0xf8] sm:$0xff]  }
  0x52   : > { %1612 = vmatpush3.bf16.msra.mxu1 %v1854_v33  ;;  %v506_v33 = vsel %vm503_vm3, %v504_v26, %v505_v23  ;;  %v640_v62 = vrot.slane %v638_v55, 2  ;;  %v1509_v26 = vld [vmem:[%s2297_s2] ss:$0 sm:$0xff] }
  0x53   : > { %1692 = vmatpush3.bf16.msra.mxu0 %v1855_v34  ;;  %1617 = vmatprep.subr.bf16.mxu1 %v1858_v36 }
  0x54   : > { %1697 = vmatprep.subr.bf16.mxu0 %v1860_v42 }
  0x55   : > { %1614 = vmatmul.mubr.bf16.vlgmr.msra.gmra.mrb[0].mxu1 %v283_v45  ;;  %v1204_v45 = vrot.slane %v1202_v43, 4 }
  0x56   : > { %1618 = vmatpush3.bf16.msra.mxu1 %v1858_v36  ;;  %1694 = vmatmul.mubr.bf16.vlgmr.msra.gmra.mrb[0].mxu0 %v784_v47  ;;  %v1882_v36 = vld [vmem:[#allocation2 + $0x90] sm:$0xff]   ;;  %v1887_v47 = vld [vmem:[#allocation2 + $0x1a0] sm:$0xff]  }
  0x57   : > { %1698 = vmatpush3.bf16.msra.mxu0 %v1860_v42  ;;  %1619 = vmatprep.subr.bf16.mxu1 %v1863_v48  ;;  %v1199_v42 = vshrl.u32 %v1912_v39, 16 }
  0x58   : > { %1699 = vmatprep.subr.bf16.mxu0 %v1864_v51  ;;  %1633 = vmatprep.mubr.bf16.mxu1 %v2135_v14  ;;  %v1034_v14 = vld [vmem:[%s2128_s30] sm:$0x8] }
  0x59   : > { %1713 = vmatprep.mubr.bf16.mxu0 %v921_v54  ;;  %v2192_v19 = vcombine.low %v1034_v14, %v2132_v13  ;;  %v652_v13 = vrot.slane %v650_v20, 2  ;;  %v1201_v44 = vrot.slane %v1199_v42, 3  ;;  %v635_v54 = vshrl.u32 %v2188_v17, 16  ;;  %v1900_v14 = vld [vmem:[#allocation2 + $0xd0] sm:$0xff]   ;;  %v1903_v17 = vld [vmem:[#allocation2 + $0x1d8] sm:$0xff]  }
  0x5a   : > { %1620 = vmatpush3.bf16.msra.mxu1 %v1863_v48  ;;  %v1908_v20 = vld [vmem:[#allocation2 + $0xf0] sm:$0xff]  }
  0x5b   : > { %1700 = vmatpush3.bf16.msra.mxu0 %v1864_v51  ;;  %1621 = vmatprep.subr.bf16.mxu1 %v1865_v53  ;;  %v1056_v30 = vrot.slane %v2192_v19, 3  ;;  %v653_v35 = vor.u32 %v652_v13, %v649_v29  ;;  %v1205_v48 = vor.u32 %v1204_v45, %v1201_v44  ;;  %v1889_v51 = vld [vmem:[#allocation2 + $0x1a8] sm:$0xff]   ;;  %v1190_v57 = vshll.u32 %v2192_v19, 16 }
  0x5c   : > { %1701 = vmatprep.subr.bf16.mxu0 %v1866_v56 }
  0x5d   : > { %v1058_v34 = vsel %vm1055_vm4, %v1056_v30, %v1057_v25  ;;  %v2210_v38 = vsel %vm633_vm5, %v2174_v59, %v653_v35  ;;  %v2215_v49 = vsel %vm1185_vm6, %v2181_v3, %v1205_v48 }
  0x5e   : > { %1622 = vmatpush3.bf16.msra.mxu1 %v1865_v53  ;;  %v1891_v53 = vld [vmem:[#allocation2 + $0x1b0] sm:$0xff]  }
  0x5f   : > { %1702 = vmatpush3.bf16.msra.mxu0 %v1866_v56  ;;  %1623 = vmatprep.subr.bf16.mxu1 %v1867_v58  ;;  %v1187_v56 = vshrl.u32 %v2192_v19, 16  ;;  %v1907_v19 = vld [vmem:[#allocation2 + $0x1e8] sm:$0xff]  }
  0x60   : > { %1703 = vmatprep.subr.bf16.mxu0 %v1868_v60 }
  0x61   : > { %v1189_v1 = vrot.slane %v1187_v56, 3 }
  0x62   : > { %1624 = vmatpush3.bf16.msra.mxu1 %v1867_v58  ;;  %v1892_v58 = vld [vmem:[#allocation2 + $0xb8] sm:$0xff]  }
  0x63   : > { %1704 = vmatpush3.bf16.msra.mxu0 %v1868_v60  ;;  %1625 = vmatprep.subr.bf16.mxu1 %v1869_v61  ;;  %v1893_v60 = vld [vmem:[#allocation2 + $0x1b8] sm:$0xff]  }
  0x64   : > { %1705 = vmatprep.subr.bf16.mxu0 %v1870_v0 }
  0x66   : > { %1626 = vmatpush3.bf16.msra.mxu1 %v1869_v61  ;;  %v637_v61 = vrot.slane %v635_v54, 1 }
  0x67   : > { %1706 = vmatpush3.bf16.msra.mxu0 %v1870_v0  ;;  %1627 = vmatprep.subr.bf16.mxu1 %v1871_v2  ;;  %v507_v0 = vrot.slane %v2150_v27, 1  ;;  %v1060_v27 = vsel %vm1055_vm4, %v1057_v25, %v1059_v5 }
  0x68   : > { %1707 = vmatprep.subr.bf16.mxu0 %v1872_v4 }
  0x6a   : > { %1628 = vmatpush3.bf16.msra.mxu1 %v1871_v2  ;;  %v1192_v2 = vrot.slane %v1190_v57, 4 }
  0x6b   : > { %1708 = vmatpush3.bf16.msra.mxu0 %v1872_v4  ;;  %1629 = vmatprep.subr.bf16.mxu1 %v1873_v7  ;;  %v1895_v4 = vld [vmem:[#allocation2 + $0xc0] sm:$0xff]  }
  0x6c   : > { %1709 = vmatprep.subr.bf16.mxu0 %v1874_v8 }
  0x6e   : > { %1630 = vmatpush3.bf16.msra.mxu1 %v1873_v7  ;;  %v641_v7 = vor.u32 %v640_v62, %v637_v61 }
  0x6f   : > { %1710 = vmatpush3.bf16.msra.mxu0 %v1874_v8  ;;  %1631 = vmatprep.subr.bf16.mxu1 %v1875_v9  ;;  %v508_v8 = vsel %vm503_vm3, %v505_v23, %v507_v0  ;;  %v1911_v23 = vld [vmem:[#allocation2 + $0x1f8] sm:$0xff]  }
  0x70   : > { %1711 = vmatprep.subr.bf16.mxu0 %v1876_v16  ;;  %v645_v63 = vsel %vm633_vm5, %v641_v7, %v2174_v59  ;;  %v1904_v59 = vld [vmem:[#allocation2 + $0xe0] sm:$0xff]  }
  0x72   : > { %1632 = vmatpush3.bf16.msra.mxu1 %v1875_v9  ;;  %v1193_v9 = vor.u32 %v1192_v2, %v1189_v1 }
  0x73   : > { %1712 = vmatpush3.bf16.msra.mxu0 %v1876_v16  ;;  %1637 = vmatprep.subr.bf16.mxu1 %v1877_v21  ;;  %v1901_v16 = vld [vmem:[#allocation2 + $0x1d0] sm:$0xff]  }
  0x74   : > { %1717 = vmatprep.subr.bf16.mxu0 %v1878_v24  ;;  %v1197_v12 = vsel %vm1185_vm6, %v1193_v9, %v2181_v3  ;;  %v1906_v3 = vld [vmem:[#allocation2 + $0xe8] sm:$0xff]  }
  0x75   : > { %1634 = vmatmul.mubr.bf16.vlgmr.msra.gmra.mrb[0].mxu1 %v2138_v15  ;;  %v1902_v15 = vld [vmem:[#allocation2 + $0xd8] sm:$0xff]  }
  0x76   : > { %1638 = vmatpush3.bf16.msra.mxu1 %v1877_v21  ;;  %1714 = vmatmul.mubr.bf16.vlgmr.msra.gmra.mrb[0].mxu0 %v930_v28  ;;  %v1909_v21 = vld [vmem:[#allocation2 + $0x1f0] sm:$0xff]  }
  0x77   : > { %1718 = vmatpush3.bf16.msra.mxu0 %v1878_v24  ;;  %1639 = vmatprep.subr.bf16.mxu1 %v1880_v31 }
  0x78   : > { %1719 = vmatprep.subr.bf16.mxu0 %v1881_v32  ;;  %1653 = vmatprep.mubr.bf16.mxu1 %v506_v33 }
  0x79   : > { %1733 = vmatprep.mubr.bf16.mxu0 %v1058_v34 }
  0x7a   : > { %1640 = vmatpush3.bf16.msra.mxu1 %v1880_v31  ;;  %v1510_v31 = vld [vmem:[%s2298_s3] ss:$0 sm:$0xff] }
  0x7b   : > { %1720 = vmatpush3.bf16.msra.mxu0 %v1881_v32  ;;  %1641 = vmatprep.subr.bf16.mxu1 %v1882_v36 }
  0x7c   : > { %1721 = vmatprep.subr.bf16.mxu0 %v1883_v37 }
  0x7e   : > { %1642 = vmatpush3.bf16.msra.mxu1 %v1882_v36 }
  0x7f   : > { %1722 = vmatpush3.bf16.msra.mxu0 %v1883_v37  ;;  %1643 = vmatprep.subr.bf16.mxu1 %v1884_v40 }
  0x80   : > { %1723 = vmatprep.subr.bf16.mxu0 %v1885_v41 }
  0x82   : > { %1644 = vmatpush3.bf16.msra.mxu1 %v1884_v40 }
  0x83   : > { %1724 = vmatpush3.bf16.msra.mxu0 %v1885_v41  ;;  %1645 = vmatprep.subr.bf16.mxu1 %v1886_v46 }
  0x84   : > { %1725 = vmatprep.subr.bf16.mxu0 %v1887_v47 }
  0x86   : > { %1646 = vmatpush3.bf16.msra.mxu1 %v1886_v46 }
  0x87   : > { %1726 = vmatpush3.bf16.msra.mxu0 %v1887_v47  ;;  %1647 = vmatprep.subr.bf16.mxu1 %v1888_v50 }
  0x88   : > { %1727 = vmatprep.subr.bf16.mxu0 %v1889_v51 }
  0x8a   : > { %1648 = vmatpush3.bf16.msra.mxu1 %v1888_v50 }
  0x8b   : > { %1728 = vmatpush3.bf16.msra.mxu0 %v1889_v51  ;;  %1649 = vmatprep.subr.bf16.mxu1 %v1890_v52 }
  0x8c   : > { %1729 = vmatprep.subr.bf16.mxu0 %v1891_v53 }
  0x8e   : > { %1650 = vmatpush3.bf16.msra.mxu1 %v1890_v52 }
  0x8f   : > { %1730 = vmatpush3.bf16.msra.mxu0 %v1891_v53  ;;  %1651 = vmatprep.subr.bf16.mxu1 %v1892_v58 }
  0x90   : > { %1731 = vmatprep.subr.bf16.mxu0 %v1893_v60 }
  0x92   : > { %1652 = vmatpush3.bf16.msra.mxu1 %v1892_v58 }
  0x93   : > { %1732 = vmatpush3.bf16.msra.mxu0 %v1893_v60  ;;  %1657 = vmatprep.subr.bf16.mxu1 %v1895_v4 }
  0x94   : > { %1737 = vmatprep.subr.bf16.mxu0 %v1897_v6 }
  0x95   : > { %1654 = vmatmul.mubr.bf16.vlgmr.msra.gmra.mrb[0].mxu1 %v508_v8 }
  0x96   : > { %1658 = vmatpush3.bf16.msra.mxu1 %v1895_v4  ;;  %1734 = vmatmul.mubr.bf16.vlgmr.msra.gmra.mrb[0].mxu0 %v1060_v27 }
  0x97   : > { %1738 = vmatpush3.bf16.msra.mxu0 %v1897_v6  ;;  %1659 = vmatprep.subr.bf16.mxu1 %v1898_v10 }
  0x98   : > { %1739 = vmatprep.subr.bf16.mxu0 %v1899_v11  ;;  %1673 = vmatprep.mubr.bf16.mxu1 %v645_v63 }
  0x99   : > { %1753 = vmatprep.mubr.bf16.mxu0 %v1197_v12 }
  0x9a   : > { %1660 = vmatpush3.bf16.msra.mxu1 %v1898_v10 }
  0x9b   : > { %1740 = vmatpush3.bf16.msra.mxu0 %v1899_v11  ;;  %1661 = vmatprep.subr.bf16.mxu1 %v1900_v14 }
  0x9c   : > { %1741 = vmatprep.subr.bf16.mxu0 %v1901_v16 }
  0x9e   : > { %1662 = vmatpush3.bf16.msra.mxu1 %v1900_v14 }
  0x9f   : > { %1742 = vmatpush3.bf16.msra.mxu0 %v1901_v16  ;;  %1663 = vmatprep.subr.bf16.mxu1 %v1902_v15 }
  0xa0   : > { %1743 = vmatprep.subr.bf16.mxu0 %v1903_v17 }
  0xa2   : > { %1664 = vmatpush3.bf16.msra.mxu1 %v1902_v15 }
  0xa3   : > { %1744 = vmatpush3.bf16.msra.mxu0 %v1903_v17  ;;  %1665 = vmatprep.subr.bf16.mxu1 %v1904_v59 }
  0xa4   : > { %1745 = vmatprep.subr.bf16.mxu0 %v1905_v18 }
  0xa6   : > { %1666 = vmatpush3.bf16.msra.mxu1 %v1904_v59 }
  0xa7   : > { %1746 = vmatpush3.bf16.msra.mxu0 %v1905_v18  ;;  %1667 = vmatprep.subr.bf16.mxu1 %v1906_v3 }
  0xa8   : > { %1747 = vmatprep.subr.bf16.mxu0 %v1907_v19 }
  0xaa   : > { %1668 = vmatpush3.bf16.msra.mxu1 %v1906_v3 }
  0xab   : > { %1748 = vmatpush3.bf16.msra.mxu0 %v1907_v19  ;;  %1669 = vmatprep.subr.bf16.mxu1 %v1908_v20 }
  0xac   : > { %1749 = vmatprep.subr.bf16.mxu0 %v1909_v21 }
  0xae   : > { %1670 = vmatpush3.bf16.msra.mxu1 %v1908_v20 }
  0xaf   : > { %1750 = vmatpush3.bf16.msra.mxu0 %v1909_v21  ;;  %1671 = vmatprep.subr.bf16.mxu1 %v1910_v22 }
  0xb0   : > { %1751 = vmatprep.subr.bf16.mxu0 %v1911_v23 }
  0xb2   : > { %1672 = vmatpush3.bf16.msra.mxu1 %v1910_v22 }
  0xb3   : > { %1752 = vmatpush3.bf16.msra.mxu0 %v1911_v23 }
  0xb5   : > { %1674 = vmatmul.mubr.bf16.vlgmr.msra.gmra.mrb[0].mxu1 %v2210_v38 }
  0xb6   : > { %1754 = vmatmul.mubr.bf16.vlgmr.msra.gmra.mrb[0].mxu0 %v2215_v49 }
 0x188   : > { %v1675_v24 = vpop.f32.mrb[0].mxu1 }
 0x189   : > { %v1755_v25 = vpop.f32.mrb[0].mxu0  ;;  %v739_v29 = vpop.f32.mrb[1].mxu1 }
 0x18a   : > { %v1757_v30 = vadd.f32 %v1755_v25, %v1675_v24  ;;  %v1291_v13 = vpop.f32.mrb[1].mxu0  ;;  %v1676_v28 = vpop.f32.mrb[2].mxu1 }
 0x18b   : > { %v1758_v32 = vadd.f32 %v1291_v13, %v739_v29  ;;  %v1756_v33 = vpop.f32.mrb[2].mxu0  ;;  %v742_v34 = vpop.f32.mrb[3].mxu1 }
 0x18c   : > { %v1319_v35 = vmul.f32 %v1757_v30, %v1509_v26  ;;  %v1759_v36 = vadd.f32 %v1756_v33, %v1676_v28  ;;  %v1294_v37 = vpop.f32.mrb[3].mxu0 }
 0x18d   : > { %v1317_v38 = vmul.f32 %v1758_v32, %v1509_v26  ;;  %v1760_v39 = vadd.f32 %v1294_v37, %v742_v34 }
 0x18e   : > { %v1330_v40 = vadd.f32 %v1510_v31, %v1319_v35  ;;  %v1320_v41 = vmul.f32 %v1759_v36, %v1509_v26 }
 0x18f   : > { %v1328_v42 = vadd.f32 %v1510_v31, %v1317_v38  ;;  %v1318_v43 = vmul.f32 %v1760_v39, %v1509_v26 }
 0x190   : > { %v1334_v44 = vmax.f32 %v1330_v40, 0.0  ;;  %v1331_v45 = vadd.f32 %v1510_v31, %v1320_v41 }
 0x191   : > { %v1332_v46 = vmax.f32 %v1328_v42, 0.0  ;;  %v1329_v47 = vadd.f32 %v1510_v31, %v1318_v43 }
 0x192   : > { %1338 = vst [vmem:[%s205_s11 + $0x10] sm:$0xff] %v1334_v44  ;;  %v1335_v48 = vmax.f32 %v1331_v45, 0.0 }
 0x193   : > { %1336 = vst [vmem:[%s205_s11] sm:$0xff] %v1332_v46  ;;  %v1333_v49 = vmax.f32 %v1329_v47, 0.0 }
 0x194   : > { %1339 = vst [vmem:[%s205_s11 + $0x18] sm:$0xff] %v1335_v48 }
 0x195   : > { %1337 = vst [vmem:[%s205_s11 + $0x8] sm:$0xff] %v1333_v49 }
 0x196   : > { %1954 = shalt.err (!%p1951_p7)
}
 0x197   : > { %s1955_s30 = scalar_lea.hbm %s2250_s22, 512  ;;  %s1959_s7 = scalar_lea.hbm %s2299_s4, 1024 }
 0x198   : > { %p1956_p8 = scmp.ne.s32.totalorder %s2250_s22, %s1955_s30  ;;  %p1960_p1 = scmp.lt.u32.totalorder %s2250_s22, %s2299_s4 }
 0x199   : > { %p1961_p0 = scmp.lt.u32.totalorder %s1959_s7, %s1955_s30  ;;  %p1963_p6 = scmp.lt.u32.totalorder %s1955_s30, %s2250_s22 }
 0x19a   : > { %p1957_p11 = pnand %p1956_p8, %p2310_p9 }
 0x19b   : > { %p1962_p5 = por %p1961_p0, %p1960_p1 }
 0x19c   : > { %p1958_p13 = pneg %p1957_p11 }
 0x19d   : > { %p1964_p10 = por %p1963_p6, %p1962_p5 }
 0x19f   : > { %p1965_p12 = pnand %p1964_p10, %p1958_p13 }
 0x1a1   : > { %1968 = shalt.err (!%p1965_p12)
}
 0x1a2   : > { %s2013_s10 = smov 128   ;;  %s2014_s11 = smov 8  }
 0x1a3   : > { %1790 = dma.vmem_to_hbm [thread:$0]  (%p2310_p9), %s2245_s12, 512, %s2250_s22, %s2254_s19, %s2013_s10, %s2013_s10, %s2014_s11  }
 0x1a4 PF: > { %p1802_p2 = scmp.ge.s32.totalorder %s2007_s18, 2  ;;  %s1369_s13 = sand.u32 1, %s1995_s15  }
 0x1a5   : > { %p2311_p3 = scmp.ne.s32.totalorder %s2304_s26, 0  ;;  %s1370_s14 = scalar_lea.sflag [#allocation4], %s1369_s13 }
 0x1a7   : > { %p1797_p4 = pnand %p1802_p2, %p2311_p3 }
 0x1a9   : > { %1990 = dma.done.wait (!%p1797_p4), %s1370_s14, 512  }
 0x1aa   : > { %1992 = vsyncadd (!%p1797_p4), %s1370_s14, 4294966784  ;;  %p15_p7 = scmp.ge.s32.totalorder %s2065_s21, 4   ;;  %s2312_s15 = smov %s1999_s16 }
 0x1ab   : > { %s2313_s16 = smov %s2003_s17  ;;  %s2314_s17 = smov %s2076_s24 }
 0x1ac   : > { %s2315_s18 = smov %s2065_s21  ;;  %17 = sbr.rel (!%p15_p7) target bundleno = 4 (0x4), region = 83 }
 0x1b3   :  { %1375 = vsyncpa [#allocation3], 1 }
 0x1b4   :  { %1377 = vsyncpa [#allocation3 + $0x1], 1 }
 0x1b5   :  { %1378 = vsyncpa [#allocation4], 1 }
 0x1b6   :  { %1380 = vsyncpa [#allocation4 + $0x1], 1 }

</bundles_post_ra>
